<compile_context>
chip_gen: v7x
topology: tpu7x:2x2x1
jax: 0.10.0
libtpu: 0.0.40
codegen_flags: <defaults>
</compile_context>

<pallas_src>
import functools

import jax
import jax.numpy as jnp
import numpy as np
from jax.experimental import pallas as pl
from jax.experimental.pallas import tpu as pltpu


def _round_up(x, m):
    return ((x + m - 1) // m) * m


def _nbytes(a):
    return int(np.prod(a.shape)) * a.dtype.itemsize


# ----------------------------------------------------------------------------
# Kernel 1: tiled matmul (+bias, +ReLU).  bf16 MXU inputs, f32 accumulator
# scratch, K-reduction streamed over the grid ("arbitrary"), M/N "parallel".
# ----------------------------------------------------------------------------
def _matmul_bias_kernel(x_ref, w_ref, b_ref, o_ref, acc_ref, *, relu):
    @pl.when(pl.program_id(2) == 0)
    def _init():
        acc_ref[...] = jnp.zeros_like(acc_ref)

    acc_ref[...] += jnp.dot(x_ref[...], w_ref[...],
                            preferred_element_type=jnp.float32)

    @pl.when(pl.program_id(2) == pl.num_programs(2) - 1)
    def _fin():
        acc = acc_ref[...] + b_ref[...]          # f32 epilogue
        if relu:
            acc = jnp.maximum(acc, 0.0)
        o_ref[...] = acc.astype(o_ref.dtype)


def _matmul_kernel(x_ref, w_ref, o_ref, acc_ref, *, relu):
    @pl.when(pl.program_id(2) == 0)
    def _init():
        acc_ref[...] = jnp.zeros_like(acc_ref)

    acc_ref[...] += jnp.dot(x_ref[...], w_ref[...],
                            preferred_element_type=jnp.float32)

    @pl.when(pl.program_id(2) == pl.num_programs(2) - 1)
    def _fin():
        acc = acc_ref[...]
        if relu:
            acc = jnp.maximum(acc, 0.0)
        o_ref[...] = acc.astype(o_ref.dtype)


def pallas_matmul(x, w, b=None, *, relu=False, tm=256, tn=256, tk=512):
    """x:[M,K] @ w:[K,N] (+ b:[N]) -> [M,N] float32.

    Pads M to sublane multiples and K/N to lane multiples (lane-dense stores),
    tiles to (tm,tn,tk) with double-buffered pipelining when dims exceed a tile.
    """
    M, K = x.shape
    K2, N = w.shape
    assert K == K2
    pM = _round_up(M, 8)
    pM = pM if pM <= tm else _round_up(pM, tm)
    pK = _round_up(K, 128)
    pK = pK if pK <= tk else _round_up(pK, tk)
    pN = _round_up(N, 128)
    pN = pN if pN <= tn else _round_up(pN, tn)
    bm, bk, bn = min(tm, pM), min(tk, pK), min(tn, pN)

    xb = jnp.zeros((pM, pK), jnp.bfloat16).at[:M, :K].set(x.astype(jnp.bfloat16))
    wb = jnp.zeros((pK, pN), jnp.bfloat16).at[:K, :N].set(w.astype(jnp.bfloat16))

    args = [xb, wb]
    in_specs = [pl.BlockSpec((bm, bk), lambda i, j, k: (i, k)),
                pl.BlockSpec((bk, bn), lambda i, j, k: (k, j))]
    if b is not None:
        bb = jnp.zeros((1, pN), jnp.float32).at[0, :N].set(b.astype(jnp.float32))
        args.append(bb)
        in_specs.append(pl.BlockSpec((1, bn), lambda i, j, k: (0, j)))
        kern = functools.partial(_matmul_bias_kernel, relu=relu)
    else:                                         # skip the bias DMA entirely
        kern = functools.partial(_matmul_kernel, relu=relu)

    grid = (pM // bm, pN // bn, pK // bk)
    cost = pl.CostEstimate(flops=2 * pM * pN * pK, transcendentals=0,
                           bytes_accessed=2 * (pM * pK + pK * pN) + 4 * pM * pN)

    out = pl.pallas_call(
        kern,
        out_shape=jax.ShapeDtypeStruct((pM, pN), jnp.float32),
        grid=grid,
        in_specs=in_specs,
        out_specs=pl.BlockSpec((bm, bn), lambda i, j, k: (i, j)),
        scratch_shapes=[pltpu.VMEM((bm, bn), jnp.float32)],
        compiler_params=pltpu.CompilerParams(
            dimension_semantics=("parallel", "parallel", "arbitrary"),
            vmem_limit_bytes=32 * 1024 * 1024),
        cost_estimate=cost,
    )(*args)
    return out[:M, :N]


# ----------------------------------------------------------------------------
# Kernel 2: fused per-pyramid-level encoder chain.
#   circular token-embed conv (no bias)  ->  num_blocks x [stride-2 conv,
#   bias, ReLU].  One batch element per grid step ("parallel" -> megacore on
#   v7x); all intermediate activations stay in VMEM / vregs.
#   Stride-2 + zero-padding is done with constant 0/1 selection matrices so
#   the whole chain is matmuls (MXU) + f32 elementwise epilogues (VPU).
# ----------------------------------------------------------------------------
def _make_level_kernel(num_blocks):
    def kernel(*refs):
        x_ref, ew_ref = refs[0], refs[1]
        out_ref = refs[-1]
        brefs = refs[2:-1]
        K = ew_ref.shape[0]
        Lp = x_ref.shape[1]
        L = Lp - (K - 1)

        xv = x_ref[0]                                   # [Lp, Cin] f32
        acc = None
        for k in range(K):                              # token embedding (no bias)
            part = jnp.dot(xv[k:k + L, :].astype(jnp.bfloat16), ew_ref[k],
                           preferred_element_type=jnp.float32)
            acc = part if acc is None else acc + part
        act = acc.astype(jnp.bfloat16)

        for j in range(num_blocks):                     # ConvBlocks
            sel_ref, w_ref, b_ref = brefs[3 * j], brefs[3 * j + 1], brefs[3 * j + 2]
            acc = None
            for k in range(K):
                # "gather" of tap k (stride 2, zero pad) as a tiny matmul
                tap = jnp.dot(sel_ref[k], act, preferred_element_type=jnp.float32)
                part = jnp.dot(tap.astype(jnp.bfloat16), w_ref[k],
                               preferred_element_type=jnp.float32)
                acc = part if acc is None else acc + part
            acc = acc + b_ref[...]                      # f32 bias + ReLU epilogue
            acc = jnp.maximum(acc, 0.0)
            act = acc.astype(jnp.bfloat16)

        out_ref[0] = act.astype(out_ref.dtype)

    return kernel


def encoder_level_forward(x_pad, embed_w, blocks, L_last, C_last):
    """x_pad: [B, L+2*pad, Cin] f32 (circularly padded), embed_w: [K,Cin,C0] bf16.
    Returns [B, L_last, C_last] bf16."""
    B, Lp, Cin = x_pad.shape
    K, _, C0 = embed_w.shape
    L = Lp - (K - 1)

    args = [x_pad, embed_w]
    in_specs = [pl.BlockSpec((1, Lp, Cin), lambda b: (b, 0, 0)),
                pl.BlockSpec((K, Cin, C0), lambda b: (0, 0, 0))]
    flops = 2 * B * K * L * Cin * C0
    bytes_acc = _nbytes(x_pad) + _nbytes(embed_w)
    for blk in blocks:
        sel, w, bias = blk["sel"], blk["w"], blk["b"]
        args += [sel, w, bias]
        in_specs += [pl.BlockSpec(sel.shape, lambda b: (0, 0, 0)),
                     pl.BlockSpec(w.shape, lambda b: (0, 0, 0)),
                     pl.BlockSpec(bias.shape, lambda b: (0, 0))]
        _, Lout, Lin = sel.shape
        _, Cj, Cj1 = w.shape
        flops += 2 * B * K * (Lout * Lin * Cj + Lout * Cj * Cj1)
        bytes_acc += _nbytes(sel) + _nbytes(w) + _nbytes(bias)
    bytes_acc += B * L_last * C_last * 2

    return pl.pallas_call(
        _make_level_kernel(len(blocks)),
        out_shape=jax.ShapeDtypeStruct((B, L_last, C_last), jnp.bfloat16),
        grid=(B,),
        in_specs=in_specs,
        out_specs=pl.BlockSpec((1, L_last, C_last), lambda b: (b, 0, 0)),
        compiler_params=pltpu.CompilerParams(
            dimension_semantics=("parallel",),
            vmem_limit_bytes=32 * 1024 * 1024),
        cost_estimate=pl.CostEstimate(flops=int(flops), transcendentals=0,
                                      bytes_accessed=int(bytes_acc)),
    )(*args)


# ----------------------------------------------------------------------------
# Deterministic synthetic parameters (PyTorch-equivalent layout).
# ----------------------------------------------------------------------------
def _winit(key, shape, scale=0.1):
    return scale * jax.random.normal(key, shape, dtype=jnp.float32)


def init_ar_params(key, *, enc_in, c_out, label_len, pred_len, fd_model,
                   kernel, block_nums, pyramid):
    assert pyramid <= block_nums
    params = []
    for i in range(pyramid):
        key, k_emb = jax.random.split(key)
        level = {"embed_w": _winit(k_emb, (kernel, enc_in, fd_model)), "convs": []}
        bn_i = block_nums - i
        ll_i = label_len // 2 ** i
        for j in range(bn_i):
            in_c = fd_model * 2 ** j
            out_c = fd_model * 2 ** (j + 1)
            key, kw, kb = jax.random.split(key, 3)
            level["convs"].append({"w": _winit(kw, (kernel, in_c, out_c)),
                                   "b": _winit(kb, (out_c,))})
        proj_in = fd_model * 2 ** bn_i * ll_i // 2 ** bn_i   # == fd_model * ll_i
        key, kw, kb = jax.random.split(key, 3)
        level["proj_w"] = _winit(kw, (proj_in, pred_len * c_out))   # cols (c, p)-ordered
        level["proj_b"] = _winit(kb, (pred_len * c_out,))
        params.append(level)
    return params


def prepare_plan(params, *, c_out, label_len, pred_len, fd_model, kernel, block_nums):
    """Weight-layout folding + constant selection matrices for the fused kernels."""
    pyramid = len(params)
    pad = kernel // 2
    P = pred_len * c_out
    levels, proj_ws = [], []
    proj_b = jnp.zeros((P,), jnp.float32)
    for i, lvl in enumerate(params):
        ll = label_len // 2 ** i
        blocks = []
        Lin = ll
        for blk in lvl["convs"]:
            Lout = (Lin + 2 * pad - kernel) // 2 + 1
            sel = np.zeros((kernel, Lout, Lin), np.float32)   # tap-k selection
            for k in range(kernel):
                for l in range(Lout):
                    m = 2 * l + k - pad
                    if 0 <= m < Lin:
                        sel[k, l, m] = 1.0
            blocks.append({"sel": jnp.asarray(sel, jnp.bfloat16),
                           "w": blk["w"].astype(jnp.bfloat16),
                           "b": blk["b"].reshape(1, -1).astype(jnp.float32)})
            Lin = Lout
        L_last = Lin
        C_last = fd_model * 2 ** (block_nums - i)
        # Fold PyTorch's view(-1, c_out, pred_len).transpose(1, 2) into the
        # projection columns: (c, p) ordering -> (p, c) ordering.
        W = lvl["proj_w"].reshape(-1, c_out, pred_len)
        Wr = jnp.transpose(W, (0, 2, 1)).reshape(-1, P)
        br = jnp.transpose(lvl["proj_b"].reshape(c_out, pred_len)).reshape(P)
        proj_ws.append(Wr)
        proj_b = proj_b + br
        levels.append({"label_len": ll,
                       "embed_w": lvl["embed_w"].astype(jnp.bfloat16),
                       "blocks": blocks, "L_last": L_last, "C_last": C_last})
    # Stack all level projections along K (sum over levels == one matmul) and
    # fold the final `/ pyramid` into the weights.
    proj_w = jnp.concatenate(proj_ws, axis=0) / pyramid
    proj_b = proj_b / pyramid
    return {"levels": levels, "proj_w": proj_w, "proj_b": proj_b,
            "pyramid": pyramid, "pred_len": pred_len, "c_out": c_out,
            "kernel": kernel}


# ----------------------------------------------------------------------------
# AR forward.
# ----------------------------------------------------------------------------
def ar_forward(plan, x_enc, x_mark=None):
    # x_mark unused: time=False / position=False / dropout=0 are no-ops.
    pad = plan["kernel"] // 2
    feats = []
    for lvl in plan["levels"]:
        ll = lvl["label_len"]
        xs = x_enc[:, -ll:, :]
        # circular pad for the TokenEmbedding conv (once, outside the kernel)
        x_pad = jnp.concatenate([xs[:, -pad:, :], xs, xs[:, :pad, :]], axis=1)
        act = encoder_level_forward(x_pad.astype(jnp.float32), lvl["embed_w"],
                                    lvl["blocks"], lvl["L_last"], lvl["C_last"])
        feats.append(act.reshape(act.shape[0], -1))   # == PyTorch Flatten order
    feat = jnp.concatenate(feats, axis=1)             # [B, sum_i F_i]
    # All pyramid-level projections + cross-level sum + /pyramid in one matmul.
    out = pallas_matmul(feat, plan["proj_w"], plan["proj_b"])
    B = out.shape[0]
    return out.reshape(B, plan["pred_len"], plan["c_out"])


# ----------------------------------------------------------------------------
# Pure-JAX reference (float32) for a correctness check.
# ----------------------------------------------------------------------------
def _ref_conv1d_nlc(x, w, b=None, *, stride=1, padding=0, circular=False, relu=False):
    K = w.shape[0]
    if padding > 0:
        if circular:
            x = jnp.concatenate([x[:, -padding:, :], x, x[:, :padding, :]], axis=1)
        else:
            x = jnp.pad(x, ((0, 0), (padding, padding), (0, 0)))
    Lout = (x.shape[1] - K) // stride + 1
    out = None
    for k in range(K):
        xs = x[:, k:k + stride * (Lout - 1) + 1:stride, :]
        term = jnp.einsum("blc,cd->bld", xs, w[k])
        out = term if out is None else out + term
    if b is not None:
        out = out + b
    if relu:
        out = jnp.maximum(out, 0.0)
    return out


def ar_reference(params, x_enc, *, label_len, pred_len, c_out, kernel):
    total = None
    for i, lvl in enumerate(params):
        ll = label_len // 2 ** i
        xs = x_enc[:, -ll:, :]
        h = _ref_conv1d_nlc(xs, lvl["embed_w"], None, stride=1,
                            padding=kernel // 2, circular=True)
        for blk in lvl["convs"]:
            h = _ref_conv1d_nlc(h, blk["w"], blk["b"], stride=2,
                                padding=kernel // 2, relu=True)
        B = h.shape[0]
        f = h.reshape(B, -1)
        o = f @ lvl["proj_w"] + lvl["proj_b"]
        o = jnp.transpose(o.reshape(B, c_out, pred_len), (0, 2, 1))
        total = o if total is None else total + o
    return total / len(params)


# ----------------------------------------------------------------------------
if __name__ == "__main__":
    B, enc_in = 2, 4
    label_len, pred_len, c_out = 16, 8, 4
    fd_model, kernel, block_nums, pyramid = 8, 3, 2, 2

    key = jax.random.PRNGKey(0)
    key, kx, km, kp = jax.random.split(key, 4)
    x_enc = jax.random.normal(kx, (B, label_len, enc_in), dtype=jnp.float32)
    x_mark = jax.random.normal(km, (B, label_len, 4), dtype=jnp.float32)

    params = init_ar_params(kp, enc_in=enc_in, c_out=c_out, label_len=label_len,
                            pred_len=pred_len, fd_model=fd_model, kernel=kernel,
                            block_nums=block_nums, pyramid=pyramid)
    plan = prepare_plan(params, c_out=c_out, label_len=label_len,
                        pred_len=pred_len, fd_model=fd_model, kernel=kernel,
                        block_nums=block_nums)

    fwd = jax.jit(lambda xe, xm: ar_forward(plan, xe, xm))
    out = jax.block_until_ready(fwd(x_enc, x_mark))
    assert out.shape == (B, pred_len, c_out), out.shape

    ref = jax.block_until_ready(
        ar_reference(params, x_enc, label_len=label_len, pred_len=pred_len,
                     c_out=c_out, kernel=kernel))
    max_err = float(jnp.max(jnp.abs(out - ref)))
    assert max_err < 5e-2, f"mismatch vs float32 reference: {max_err}"
    print("KERNEL_OK")
</pallas_src>

<mosaic_0001>
module attributes {stable_mosaic.version = 11 : i64} {
  func.func @kernel(%arg0: i32, %arg1: memref<1x10x4xf32, #tpu.memory_space<vmem>>, %arg2: memref<3x4x8xbf16, #tpu.memory_space<vmem>>, %arg3: memref<3x4x8xbf16, #tpu.memory_space<vmem>>, %arg4: memref<3x8x16xbf16, #tpu.memory_space<vmem>>, %arg5: memref<1x16xf32, #tpu.memory_space<vmem>>, %arg6: memref<1x4x16xbf16, #tpu.memory_space<vmem>>) attributes {dimension_semantics = [#tpu.dimension_semantics<parallel>], iteration_bounds = array<i64: 2>, scalar_prefetch = 0 : i64, scratch_operands = 0 : i64, tpu.core_type = #tpu.core_type<tc>, window_params = [{transform_indices = @transform_0, window_bounds = array<i64: 1, 10, 4>}, {pipeline_mode = #tpu.pipeline_mode<synchronous>, transform_indices = @transform_1, window_bounds = array<i64: 3, 4, 8>}, {pipeline_mode = #tpu.pipeline_mode<synchronous>, transform_indices = @transform_2, window_bounds = array<i64: 3, 4, 8>}, {pipeline_mode = #tpu.pipeline_mode<synchronous>, transform_indices = @transform_3, window_bounds = array<i64: 3, 8, 16>}, {pipeline_mode = #tpu.pipeline_mode<synchronous>, transform_indices = @transform_4, window_bounds = array<i64: 1, 16>}, {transform_indices = @transform_5, window_bounds = array<i64: 1, 4, 16>}]} {
    %c0 = arith.constant 0 : index
    %c0_0 = arith.constant 0 : index
    %c0_1 = arith.constant 0 : index
    %0 = vector.load %arg1[%c0, %c0_0, %c0_1] : memref<1x10x4xf32, #tpu.memory_space<vmem>>, vector<1x10x4xf32>
    %1 = vector.shape_cast %0 : vector<1x10x4xf32> to vector<10x4xf32>
    %2 = vector.extract_strided_slice %1 {offsets = [0, 0], sizes = [8, 4], strides = [1, 1]} : vector<10x4xf32> to vector<8x4xf32>
    %3 = arith.truncf %2 : vector<8x4xf32> to vector<8x4xbf16>
    %c0_2 = arith.constant 0 : index
    %c0_3 = arith.constant 0 : index
    %c0_4 = arith.constant 0 : index
    %4 = vector.load %arg2[%c0_2, %c0_3, %c0_4] : memref<3x4x8xbf16, #tpu.memory_space<vmem>>, vector<1x4x8xbf16>
    %5 = vector.shape_cast %4 : vector<1x4x8xbf16> to vector<4x8xbf16>
    %cst = arith.constant dense<0.000000e+00> : vector<8x8xf32>
    %6 = tpu.matmul %3, %5, %cst {dimension_numbers = #tpu.dot_dimension_numbers<[1], [0], [0], [1], [0, 0, 1, 1], [], []>} : vector<8x4xbf16>, vector<4x8xbf16>, vector<8x8xf32> -> vector<8x8xf32>
    %7 = vector.extract_strided_slice %1 {offsets = [1, 0], sizes = [8, 4], strides = [1, 1]} : vector<10x4xf32> to vector<8x4xf32>
    %8 = arith.truncf %7 : vector<8x4xf32> to vector<8x4xbf16>
    %c1 = arith.constant 1 : index
    %c0_5 = arith.constant 0 : index
    %c0_6 = arith.constant 0 : index
    %9 = vector.load %arg2[%c1, %c0_5, %c0_6] : memref<3x4x8xbf16, #tpu.memory_space<vmem>>, vector<1x4x8xbf16>
    %10 = vector.shape_cast %9 : vector<1x4x8xbf16> to vector<4x8xbf16>
    %cst_7 = arith.constant dense<0.000000e+00> : vector<8x8xf32>
    %11 = tpu.matmul %8, %10, %cst_7 {dimension_numbers = #tpu.dot_dimension_numbers<[1], [0], [0], [1], [0, 0, 1, 1], [], []>} : vector<8x4xbf16>, vector<4x8xbf16>, vector<8x8xf32> -> vector<8x8xf32>
    %12 = arith.addf %6, %11 : vector<8x8xf32>
    %13 = vector.extract_strided_slice %1 {offsets = [2, 0], sizes = [8, 4], strides = [1, 1]} : vector<10x4xf32> to vector<8x4xf32>
    %14 = arith.truncf %13 : vector<8x4xf32> to vector<8x4xbf16>
    %c2 = arith.constant 2 : index
    %c0_8 = arith.constant 0 : index
    %c0_9 = arith.constant 0 : index
    %15 = vector.load %arg2[%c2, %c0_8, %c0_9] : memref<3x4x8xbf16, #tpu.memory_space<vmem>>, vector<1x4x8xbf16>
    %16 = vector.shape_cast %15 : vector<1x4x8xbf16> to vector<4x8xbf16>
    %cst_10 = arith.constant dense<0.000000e+00> : vector<8x8xf32>
    %17 = tpu.matmul %14, %16, %cst_10 {dimension_numbers = #tpu.dot_dimension_numbers<[1], [0], [0], [1], [0, 0, 1, 1], [], []>} : vector<8x4xbf16>, vector<4x8xbf16>, vector<8x8xf32> -> vector<8x8xf32>
    %18 = arith.addf %12, %17 : vector<8x8xf32>
    %19 = arith.truncf %18 : vector<8x8xf32> to vector<8x8xbf16>
    %c0_11 = arith.constant 0 : index
    %c0_12 = arith.constant 0 : index
    %c0_13 = arith.constant 0 : index
    %20 = vector.load %arg3[%c0_11, %c0_12, %c0_13] : memref<3x4x8xbf16, #tpu.memory_space<vmem>>, vector<1x4x8xbf16>
    %21 = vector.shape_cast %20 : vector<1x4x8xbf16> to vector<4x8xbf16>
    %cst_14 = arith.constant dense<0.000000e+00> : vector<4x8xf32>
    %22 = tpu.matmul %21, %19, %cst_14 {dimension_numbers = #tpu.dot_dimension_numbers<[1], [0], [0], [1], [0, 0, 1, 1], [], []>} : vector<4x8xbf16>, vector<8x8xbf16>, vector<4x8xf32> -> vector<4x8xf32>
    %23 = arith.truncf %22 : vector<4x8xf32> to vector<4x8xbf16>
    %c0_15 = arith.constant 0 : index
    %c0_16 = arith.constant 0 : index
    %c0_17 = arith.constant 0 : index
    %24 = vector.load %arg4[%c0_15, %c0_16, %c0_17] : memref<3x8x16xbf16, #tpu.memory_space<vmem>>, vector<1x8x16xbf16>
    %25 = vector.shape_cast %24 : vector<1x8x16xbf16> to vector<8x16xbf16>
    %cst_18 = arith.constant dense<0.000000e+00> : vector<4x16xf32>
    %26 = tpu.matmul %23, %25, %cst_18 {dimension_numbers = #tpu.dot_dimension_numbers<[1], [0], [0], [1], [0, 0, 1, 1], [], []>} : vector<4x8xbf16>, vector<8x16xbf16>, vector<4x16xf32> -> vector<4x16xf32>
    %c1_19 = arith.constant 1 : index
    %c0_20 = arith.constant 0 : index
    %c0_21 = arith.constant 0 : index
    %27 = vector.load %arg3[%c1_19, %c0_20, %c0_21] : memref<3x4x8xbf16, #tpu.memory_space<vmem>>, vector<1x4x8xbf16>
    %28 = vector.shape_cast %27 : vector<1x4x8xbf16> to vector<4x8xbf16>
    %cst_22 = arith.constant dense<0.000000e+00> : vector<4x8xf32>
    %29 = tpu.matmul %28, %19, %cst_22 {dimension_numbers = #tpu.dot_dimension_numbers<[1], [0], [0], [1], [0, 0, 1, 1], [], []>} : vector<4x8xbf16>, vector<8x8xbf16>, vector<4x8xf32> -> vector<4x8xf32>
    %30 = arith.truncf %29 : vector<4x8xf32> to vector<4x8xbf16>
    %c1_23 = arith.constant 1 : index
    %c0_24 = arith.constant 0 : index
    %c0_25 = arith.constant 0 : index
    %31 = vector.load %arg4[%c1_23, %c0_24, %c0_25] : memref<3x8x16xbf16, #tpu.memory_space<vmem>>, vector<1x8x16xbf16>
    %32 = vector.shape_cast %31 : vector<1x8x16xbf16> to vector<8x16xbf16>
    %cst_26 = arith.constant dense<0.000000e+00> : vector<4x16xf32>
    %33 = tpu.matmul %30, %32, %cst_26 {dimension_numbers = #tpu.dot_dimension_numbers<[1], [0], [0], [1], [0, 0, 1, 1], [], []>} : vector<4x8xbf16>, vector<8x16xbf16>, vector<4x16xf32> -> vector<4x16xf32>
    %34 = arith.addf %26, %33 : vector<4x16xf32>
    %c2_27 = arith.constant 2 : index
    %c0_28 = arith.constant 0 : index
    %c0_29 = arith.constant 0 : index
    %35 = vector.load %arg3[%c2_27, %c0_28, %c0_29] : memref<3x4x8xbf16, #tpu.memory_space<vmem>>, vector<1x4x8xbf16>
    %36 = vector.shape_cast %35 : vector<1x4x8xbf16> to vector<4x8xbf16>
    %cst_30 = arith.constant dense<0.000000e+00> : vector<4x8xf32>
    %37 = tpu.matmul %36, %19, %cst_30 {dimension_numbers = #tpu.dot_dimension_numbers<[1], [0], [0], [1], [0, 0, 1, 1], [], []>} : vector<4x8xbf16>, vector<8x8xbf16>, vector<4x8xf32> -> vector<4x8xf32>
    %38 = arith.truncf %37 : vector<4x8xf32> to vector<4x8xbf16>
    %c2_31 = arith.constant 2 : index
    %c0_32 = arith.constant 0 : index
    %c0_33 = arith.constant 0 : index
    %39 = vector.load %arg4[%c2_31, %c0_32, %c0_33] : memref<3x8x16xbf16, #tpu.memory_space<vmem>>, vector<1x8x16xbf16>
    %40 = vector.shape_cast %39 : vector<1x8x16xbf16> to vector<8x16xbf16>
    %cst_34 = arith.constant dense<0.000000e+00> : vector<4x16xf32>
    %41 = tpu.matmul %38, %40, %cst_34 {dimension_numbers = #tpu.dot_dimension_numbers<[1], [0], [0], [1], [0, 0, 1, 1], [], []>} : vector<4x8xbf16>, vector<8x16xbf16>, vector<4x16xf32> -> vector<4x16xf32>
    %42 = arith.addf %34, %41 : vector<4x16xf32>
    %c0_35 = arith.constant 0 : index
    %c0_36 = arith.constant 0 : index
    %43 = vector.load %arg5[%c0_35, %c0_36] : memref<1x16xf32, #tpu.memory_space<vmem>>, vector<1x16xf32>
    %44 = vector.broadcast %43 : vector<1x16xf32> to vector<4x16xf32>
    %45 = arith.addf %42, %44 : vector<4x16xf32>
    %cst_37 = arith.constant 0.000000e+00 : f32
    %46 = vector.broadcast %cst_37 : f32 to vector<4x16xf32>
    %47 = arith.maximumf %45, %46 : vector<4x16xf32>
    %48 = arith.truncf %47 : vector<4x16xf32> to vector<4x16xbf16>
    %c0_38 = arith.constant 0 : index
    %c0_39 = arith.constant 0 : index
    %c0_40 = arith.constant 0 : index
    %49 = vector.load %arg6[%c0_38, %c0_39, %c0_40] : memref<1x4x16xbf16, #tpu.memory_space<vmem>>, vector<1x4x16xbf16>
    %50 = vector.shape_cast %49 : vector<1x4x16xbf16> to vector<4x16xbf16>
    %51 = vector.shape_cast %48 : vector<4x16xbf16> to vector<1x4x16xbf16>
    tpu.vector_store %arg6[%c0_38, %c0_39, %c0_40], %51 {strides = array<i32>} : memref<1x4x16xbf16, #tpu.memory_space<vmem>>, vector<1x4x16xbf16>,
    return
  }
  func.func @transform_0(%arg0: i32) -> (i32, i32, i32) {
    %c0_i32 = arith.constant 0 : i32
    %c0_i32_0 = arith.constant 0 : i32
    %c0_i32_1 = arith.constant 0 : i32
    return %arg0, %c0_i32, %c0_i32_0 : i32, i32, i32
  }
  func.func @transform_1(%arg0: i32) -> (i32, i32, i32) {
    %c0_i32 = arith.constant 0 : i32
    %c0_i32_0 = arith.constant 0 : i32
    %c0_i32_1 = arith.constant 0 : i32
    %c0_i32_2 = arith.constant 0 : i32
    return %c0_i32, %c0_i32_0, %c0_i32_1 : i32, i32, i32
  }
  func.func @transform_2(%arg0: i32) -> (i32, i32, i32) {
    %c0_i32 = arith.constant 0 : i32
    %c0_i32_0 = arith.constant 0 : i32
    %c0_i32_1 = arith.constant 0 : i32
    %c0_i32_2 = arith.constant 0 : i32
    return %c0_i32, %c0_i32_0, %c0_i32_1 : i32, i32, i32
  }
  func.func @transform_3(%arg0: i32) -> (i32, i32, i32) {
    %c0_i32 = arith.constant 0 : i32
    %c0_i32_0 = arith.constant 0 : i32
    %c0_i32_1 = arith.constant 0 : i32
    %c0_i32_2 = arith.constant 0 : i32
    return %c0_i32, %c0_i32_0, %c0_i32_1 : i32, i32, i32
  }
  func.func @transform_4(%arg0: i32) -> (i32, i32) {
    %c0_i32 = arith.constant 0 : i32
    %c0_i32_0 = arith.constant 0 : i32
    %c0_i32_1 = arith.constant 0 : i32
    return %c0_i32, %c0_i32_0 : i32, i32
  }
  func.func @transform_5(%arg0: i32) -> (i32, i32, i32) {
    %c0_i32 = arith.constant 0 : i32
    %c0_i32_0 = arith.constant 0 : i32
    %c0_i32_1 = arith.constant 0 : i32
    return %arg0, %c0_i32, %c0_i32_0 : i32, i32, i32
  }
}

module attributes {stable_mosaic.version = 11 : i64} {
  func.func @kernel(%arg0: i32, %arg1: memref<1x18x4xf32, #tpu.memory_space<vmem>>, %arg2: memref<3x4x8xbf16, #tpu.memory_space<vmem>>, %arg3: memref<3x8x16xbf16, #tpu.memory_space<vmem>>, %arg4: memref<3x8x16xbf16, #tpu.memory_space<vmem>>, %arg5: memref<1x16xf32, #tpu.memory_space<vmem>>, %arg6: memref<3x4x8xbf16, #tpu.memory_space<vmem>>, %arg7: memref<3x16x32xbf16, #tpu.memory_space<vmem>>, %arg8: memref<1x32xf32, #tpu.memory_space<vmem>>, %arg9: memref<1x4x32xbf16, #tpu.memory_space<vmem>>) attributes {dimension_semantics = [#tpu.dimension_semantics<parallel>], iteration_bounds = array<i64: 2>, scalar_prefetch = 0 : i64, scratch_operands = 0 : i64, tpu.core_type = #tpu.core_type<tc>, window_params = [{transform_indices = @transform_0, window_bounds = array<i64: 1, 18, 4>}, {pipeline_mode = #tpu.pipeline_mode<synchronous>, transform_indices = @transform_1, window_bounds = array<i64: 3, 4, 8>}, {pipeline_mode = #tpu.pipeline_mode<synchronous>, transform_indices = @transform_2, window_bounds = array<i64: 3, 8, 16>}, {pipeline_mode = #tpu.pipeline_mode<synchronous>, transform_indices = @transform_3, window_bounds = array<i64: 3, 8, 16>}, {pipeline_mode = #tpu.pipeline_mode<synchronous>, transform_indices = @transform_4, window_bounds = array<i64: 1, 16>}, {pipeline_mode = #tpu.pipeline_mode<synchronous>, transform_indices = @transform_5, window_bounds = array<i64: 3, 4, 8>}, {pipeline_mode = #tpu.pipeline_mode<synchronous>, transform_indices = @transform_6, window_bounds = array<i64: 3, 16, 32>}, {pipeline_mode = #tpu.pipeline_mode<synchronous>, transform_indices = @transform_7, window_bounds = array<i64: 1, 32>}, {transform_indices = @transform_8, window_bounds = array<i64: 1, 4, 32>}]} {
    %c0 = arith.constant 0 : index
    %c0_0 = arith.constant 0 : index
    %c0_1 = arith.constant 0 : index
    %0 = vector.load %arg1[%c0, %c0_0, %c0_1] : memref<1x18x4xf32, #tpu.memory_space<vmem>>, vector<1x18x4xf32>
    %1 = vector.shape_cast %0 : vector<1x18x4xf32> to vector<18x4xf32>
    %2 = vector.extract_strided_slice %1 {offsets = [0, 0], sizes = [16, 4], strides = [1, 1]} : vector<18x4xf32> to vector<16x4xf32>
    %3 = arith.truncf %2 : vector<16x4xf32> to vector<16x4xbf16>
    %c0_2 = arith.constant 0 : index
    %c0_3 = arith.constant 0 : index
    %c0_4 = arith.constant 0 : index
    %4 = vector.load %arg2[%c0_2, %c0_3, %c0_4] : memref<3x4x8xbf16, #tpu.memory_space<vmem>>, vector<1x4x8xbf16>
    %5 = vector.shape_cast %4 : vector<1x4x8xbf16> to vector<4x8xbf16>
    %cst = arith.constant dense<0.000000e+00> : vector<16x8xf32>
    %6 = tpu.matmul %3, %5, %cst {dimension_numbers = #tpu.dot_dimension_numbers<[1], [0], [0], [1], [0, 0, 1, 1], [], []>} : vector<16x4xbf16>, vector<4x8xbf16>, vector<16x8xf32> -> vector<16x8xf32>
    %7 = vector.extract_strided_slice %1 {offsets = [1, 0], sizes = [16, 4], strides = [1, 1]} : vector<18x4xf32> to vector<16x4xf32>
    %8 = arith.truncf %7 : vector<16x4xf32> to vector<16x4xbf16>
    %c1 = arith.constant 1 : index
    %c0_5 = arith.constant 0 : index
    %c0_6 = arith.constant 0 : index
    %9 = vector.load %arg2[%c1, %c0_5, %c0_6] : memref<3x4x8xbf16, #tpu.memory_space<vmem>>, vector<1x4x8xbf16>
    %10 = vector.shape_cast %9 : vector<1x4x8xbf16> to vector<4x8xbf16>
    %cst_7 = arith.constant dense<0.000000e+00> : vector<16x8xf32>
    %11 = tpu.matmul %8, %10, %cst_7 {dimension_numbers = #tpu.dot_dimension_numbers<[1], [0], [0], [1], [0, 0, 1, 1], [], []>} : vector<16x4xbf16>, vector<4x8xbf16>, vector<16x8xf32> -> vector<16x8xf32>
    %12 = arith.addf %6, %11 : vector<16x8xf32>
    %13 = vector.extract_strided_slice %1 {offsets = [2, 0], sizes = [16, 4], strides = [1, 1]} : vector<18x4xf32> to vector<16x4xf32>
    %14 = arith.truncf %13 : vector<16x4xf32> to vector<16x4xbf16>
    %c2 = arith.constant 2 : index
    %c0_8 = arith.constant 0 : index
    %c0_9 = arith.constant 0 : index
    %15 = vector.load %arg2[%c2, %c0_8, %c0_9] : memref<3x4x8xbf16, #tpu.memory_space<vmem>>, vector<1x4x8xbf16>
    %16 = vector.shape_cast %15 : vector<1x4x8xbf16> to vector<4x8xbf16>
    %cst_10 = arith.constant dense<0.000000e+00> : vector<16x8xf32>
    %17 = tpu.matmul %14, %16, %cst_10 {dimension_numbers = #tpu.dot_dimension_numbers<[1], [0], [0], [1], [0, 0, 1, 1], [], []>} : vector<16x4xbf16>, vector<4x8xbf16>, vector<16x8xf32> -> vector<16x8xf32>
    %18 = arith.addf %12, %17 : vector<16x8xf32>
    %19 = arith.truncf %18 : vector<16x8xf32> to vector<16x8xbf16>
    %c0_11 = arith.constant 0 : index
    %c0_12 = arith.constant 0 : index
    %c0_13 = arith.constant 0 : index
    %20 = vector.load %arg3[%c0_11, %c0_12, %c0_13] : memref<3x8x16xbf16, #tpu.memory_space<vmem>>, vector<1x8x16xbf16>
    %21 = vector.shape_cast %20 : vector<1x8x16xbf16> to vector<8x16xbf16>
    %cst_14 = arith.constant dense<0.000000e+00> : vector<8x8xf32>
    %22 = tpu.matmul %21, %19, %cst_14 {dimension_numbers = #tpu.dot_dimension_numbers<[1], [0], [0], [1], [0, 0, 1, 1], [], []>} : vector<8x16xbf16>, vector<16x8xbf16>, vector<8x8xf32> -> vector<8x8xf32>
    %23 = arith.truncf %22 : vector<8x8xf32> to vector<8x8xbf16>
    %c0_15 = arith.constant 0 : index
    %c0_16 = arith.constant 0 : index
    %c0_17 = arith.constant 0 : index
    %24 = vector.load %arg4[%c0_15, %c0_16, %c0_17] : memref<3x8x16xbf16, #tpu.memory_space<vmem>>, vector<1x8x16xbf16>
    %25 = vector.shape_cast %24 : vector<1x8x16xbf16> to vector<8x16xbf16>
    %cst_18 = arith.constant dense<0.000000e+00> : vector<8x16xf32>
    %26 = tpu.matmul %23, %25, %cst_18 {dimension_numbers = #tpu.dot_dimension_numbers<[1], [0], [0], [1], [0, 0, 1, 1], [], []>} : vector<8x8xbf16>, vector<8x16xbf16>, vector<8x16xf32> -> vector<8x16xf32>
    %c1_19 = arith.constant 1 : index
    %c0_20 = arith.constant 0 : index
    %c0_21 = arith.constant 0 : index
    %27 = vector.load %arg3[%c1_19, %c0_20, %c0_21] : memref<3x8x16xbf16, #tpu.memory_space<vmem>>, vector<1x8x16xbf16>
    %28 = vector.shape_cast %27 : vector<1x8x16xbf16> to vector<8x16xbf16>
    %cst_22 = arith.constant dense<0.000000e+00> : vector<8x8xf32>
    %29 = tpu.matmul %28, %19, %cst_22 {dimension_numbers = #tpu.dot_dimension_numbers<[1], [0], [0], [1], [0, 0, 1, 1], [], []>} : vector<8x16xbf16>, vector<16x8xbf16>, vector<8x8xf32> -> vector<8x8xf32>
    %30 = arith.truncf %29 : vector<8x8xf32> to vector<8x8xbf16>
    %c1_23 = arith.constant 1 : index
    %c0_24 = arith.constant 0 : index
    %c0_25 = arith.constant 0 : index
    %31 = vector.load %arg4[%c1_23, %c0_24, %c0_25] : memref<3x8x16xbf16, #tpu.memory_space<vmem>>, vector<1x8x16xbf16>
    %32 = vector.shape_cast %31 : vector<1x8x16xbf16> to vector<8x16xbf16>
    %cst_26 = arith.constant dense<0.000000e+00> : vector<8x16xf32>
    %33 = tpu.matmul %30, %32, %cst_26 {dimension_numbers = #tpu.dot_dimension_numbers<[1], [0], [0], [1], [0, 0, 1, 1], [], []>} : vector<8x8xbf16>, vector<8x16xbf16>, vector<8x16xf32> -> vector<8x16xf32>
    %34 = arith.addf %26, %33 : vector<8x16xf32>
    %c2_27 = arith.constant 2 : index
    %c0_28 = arith.constant 0 : index
    %c0_29 = arith.constant 0 : index
    %35 = vector.load %arg3[%c2_27, %c0_28, %c0_29] : memref<3x8x16xbf16, #tpu.memory_space<vmem>>, vector<1x8x16xbf16>
    %36 = vector.shape_cast %35 : vector<1x8x16xbf16> to vector<8x16xbf16>
    %cst_30 = arith.constant dense<0.000000e+00> : vector<8x8xf32>
    %37 = tpu.matmul %36, %19, %cst_30 {dimension_numbers = #tpu.dot_dimension_numbers<[1], [0], [0], [1], [0, 0, 1, 1], [], []>} : vector<8x16xbf16>, vector<16x8xbf16>, vector<8x8xf32> -> vector<8x8xf32>
    %38 = arith.truncf %37 : vector<8x8xf32> to vector<8x8xbf16>
    %c2_31 = arith.constant 2 : index
    %c0_32 = arith.constant 0 : index
    %c0_33 = arith.constant 0 : index
    %39 = vector.load %arg4[%c2_31, %c0_32, %c0_33] : memref<3x8x16xbf16, #tpu.memory_space<vmem>>, vector<1x8x16xbf16>
    %40 = vector.shape_cast %39 : vector<1x8x16xbf16> to vector<8x16xbf16>
    %cst_34 = arith.constant dense<0.000000e+00> : vector<8x16xf32>
    %41 = tpu.matmul %38, %40, %cst_34 {dimension_numbers = #tpu.dot_dimension_numbers<[1], [0], [0], [1], [0, 0, 1, 1], [], []>} : vector<8x8xbf16>, vector<8x16xbf16>, vector<8x16xf32> -> vector<8x16xf32>
    %42 = arith.addf %34, %41 : vector<8x16xf32>
    %c0_35 = arith.constant 0 : index
    %c0_36 = arith.constant 0 : index
    %43 = vector.load %arg5[%c0_35, %c0_36] : memref<1x16xf32, #tpu.memory_space<vmem>>, vector<1x16xf32>
    %44 = vector.broadcast %43 : vector<1x16xf32> to vector<8x16xf32>
    %45 = arith.addf %42, %44 : vector<8x16xf32>
    %cst_37 = arith.constant 0.000000e+00 : f32
    %46 = vector.broadcast %cst_37 : f32 to vector<8x16xf32>
    %47 = arith.maximumf %45, %46 : vector<8x16xf32>
    %48 = arith.truncf %47 : vector<8x16xf32> to vector<8x16xbf16>
    %c0_38 = arith.constant 0 : index
    %c0_39 = arith.constant 0 : index
    %c0_40 = arith.constant 0 : index
    %49 = vector.load %arg6[%c0_38, %c0_39, %c0_40] : memref<3x4x8xbf16, #tpu.memory_space<vmem>>, vector<1x4x8xbf16>
    %50 = vector.shape_cast %49 : vector<1x4x8xbf16> to vector<4x8xbf16>
    %cst_41 = arith.constant dense<0.000000e+00> : vector<4x16xf32>
    %51 = tpu.matmul %50, %48, %cst_41 {dimension_numbers = #tpu.dot_dimension_numbers<[1], [0], [0], [1], [0, 0, 1, 1], [], []>} : vector<4x8xbf16>, vector<8x16xbf16>, vector<4x16xf32> -> vector<4x16xf32>
    %52 = arith.truncf %51 : vector<4x16xf32> to vector<4x16xbf16>
    %c0_42 = arith.constant 0 : index
    %c0_43 = arith.constant 0 : index
    %c0_44 = arith.constant 0 : index
    %53 = vector.load %arg7[%c0_42, %c0_43, %c0_44] : memref<3x16x32xbf16, #tpu.memory_space<vmem>>, vector<1x16x32xbf16>
    %54 = vector.shape_cast %53 : vector<1x16x32xbf16> to vector<16x32xbf16>
    %cst_45 = arith.constant dense<0.000000e+00> : vector<4x32xf32>
    %55 = tpu.matmul %52, %54, %cst_45 {dimension_numbers = #tpu.dot_dimension_numbers<[1], [0], [0], [1], [0, 0, 1, 1], [], []>} : vector<4x16xbf16>, vector<16x32xbf16>, vector<4x32xf32> -> vector<4x32xf32>
    %c1_46 = arith.constant 1 : index
    %c0_47 = arith.constant 0 : index
    %c0_48 = arith.constant 0 : index
    %56 = vector.load %arg6[%c1_46, %c0_47, %c0_48] : memref<3x4x8xbf16, #tpu.memory_space<vmem>>, vector<1x4x8xbf16>
    %57 = vector.shape_cast %56 : vector<1x4x8xbf16> to vector<4x8xbf16>
    %cst_49 = arith.constant dense<0.000000e+00> : vector<4x16xf32>
    %58 = tpu.matmul %57, %48, %cst_49 {dimension_numbers = #tpu.dot_dimension_numbers<[1], [0], [0], [1], [0, 0, 1, 1], [], []>} : vector<4x8xbf16>, vector<8x16xbf16>, vector<4x16xf32> -> vector<4x16xf32>
    %59 = arith.truncf %58 : vector<4x16xf32> to vector<4x16xbf16>
    %c1_50 = arith.constant 1 : index
    %c0_51 = arith.constant 0 : index
    %c0_52 = arith.constant 0 : index
    %60 = vector.load %arg7[%c1_50, %c0_51, %c0_52] : memref<3x16x32xbf16, #tpu.memory_space<vmem>>, vector<1x16x32xbf16>
    %61 = vector.shape_cast %60 : vector<1x16x32xbf16> to vector<16x32xbf16>
    %cst_53 = arith.constant dense<0.000000e+00> : vector<4x32xf32>
    %62 = tpu.matmul %59, %61, %cst_53 {dimension_numbers = #tpu.dot_dimension_numbers<[1], [0], [0], [1], [0, 0, 1, 1], [], []>} : vector<4x16xbf16>, vector<16x32xbf16>, vector<4x32xf32> -> vector<4x32xf32>
    %63 = arith.addf %55, %62 : vector<4x32xf32>
    %c2_54 = arith.constant 2 : index
    %c0_55 = arith.constant 0 : index
    %c0_56 = arith.constant 0 : index
    %64 = vector.load %arg6[%c2_54, %c0_55, %c0_56] : memref<3x4x8xbf16, #tpu.memory_space<vmem>>, vector<1x4x8xbf16>
    %65 = vector.shape_cast %64 : vector<1x4x8xbf16> to vector<4x8xbf16>
    %cst_57 = arith.constant dense<0.000000e+00> : vector<4x16xf32>
    %66 = tpu.matmul %65, %48, %cst_57 {dimension_numbers = #tpu.dot_dimension_numbers<[1], [0], [0], [1], [0, 0, 1, 1], [], []>} : vector<4x8xbf16>, vector<8x16xbf16>, vector<4x16xf32> -> vector<4x16xf32>
    %67 = arith.truncf %66 : vector<4x16xf32> to vector<4x16xbf16>
    %c2_58 = arith.constant 2 : index
    %c0_59 = arith.constant 0 : index
    %c0_60 = arith.constant 0 : index
    %68 = vector.load %arg7[%c2_58, %c0_59, %c0_60] : memref<3x16x32xbf16, #tpu.memory_space<vmem>>, vector<1x16x32xbf16>
    %69 = vector.shape_cast %68 : vector<1x16x32xbf16> to vector<16x32xbf16>
    %cst_61 = arith.constant dense<0.000000e+00> : vector<4x32xf32>
    %70 = tpu.matmul %67, %69, %cst_61 {dimension_numbers = #tpu.dot_dimension_numbers<[1], [0], [0], [1], [0, 0, 1, 1], [], []>} : vector<4x16xbf16>, vector<16x32xbf16>, vector<4x32xf32> -> vector<4x32xf32>
    %71 = arith.addf %63, %70 : vector<4x32xf32>
    %c0_62 = arith.constant 0 : index
    %c0_63 = arith.constant 0 : index
    %72 = vector.load %arg8[%c0_62, %c0_63] : memref<1x32xf32, #tpu.memory_space<vmem>>, vector<1x32xf32>
    %73 = vector.broadcast %72 : vector<1x32xf32> to vector<4x32xf32>
    %74 = arith.addf %71, %73 : vector<4x32xf32>
    %cst_64 = arith.constant 0.000000e+00 : f32
    %75 = vector.broadcast %cst_64 : f32 to vector<4x32xf32>
    %76 = arith.maximumf %74, %75 : vector<4x32xf32>
    %77 = arith.truncf %76 : vector<4x32xf32> to vector<4x32xbf16>
    %c0_65 = arith.constant 0 : index
    %c0_66 = arith.constant 0 : index
    %c0_67 = arith.constant 0 : index
    %78 = vector.load %arg9[%c0_65, %c0_66, %c0_67] : memref<1x4x32xbf16, #tpu.memory_space<vmem>>, vector<1x4x32xbf16>
    %79 = vector.shape_cast %78 : vector<1x4x32xbf16> to vector<4x32xbf16>
    %80 = vector.shape_cast %77 : vector<4x32xbf16> to vector<1x4x32xbf16>
    tpu.vector_store %arg9[%c0_65, %c0_66, %c0_67], %80 {strides = array<i32>} : memref<1x4x32xbf16, #tpu.memory_space<vmem>>, vector<1x4x32xbf16>,
    return
  }
  func.func @transform_0(%arg0: i32) -> (i32, i32, i32) {
    %c0_i32 = arith.constant 0 : i32
    %c0_i32_0 = arith.constant 0 : i32
    %c0_i32_1 = arith.constant 0 : i32
    return %arg0, %c0_i32, %c0_i32_0 : i32, i32, i32
  }
  func.func @transform_1(%arg0: i32) -> (i32, i32, i32) {
    %c0_i32 = arith.constant 0 : i32
    %c0_i32_0 = arith.constant 0 : i32
    %c0_i32_1 = arith.constant 0 : i32
    %c0_i32_2 = arith.constant 0 : i32
    return %c0_i32, %c0_i32_0, %c0_i32_1 : i32, i32, i32
  }
  func.func @transform_2(%arg0: i32) -> (i32, i32, i32) {
    %c0_i32 = arith.constant 0 : i32
    %c0_i32_0 = arith.constant 0 : i32
    %c0_i32_1 = arith.constant 0 : i32
    %c0_i32_2 = arith.constant 0 : i32
    return %c0_i32, %c0_i32_0, %c0_i32_1 : i32, i32, i32
  }
  func.func @transform_3(%arg0: i32) -> (i32, i32, i32) {
    %c0_i32 = arith.constant 0 : i32
    %c0_i32_0 = arith.constant 0 : i32
    %c0_i32_1 = arith.constant 0 : i32
    %c0_i32_2 = arith.constant 0 : i32
    return %c0_i32, %c0_i32_0, %c0_i32_1 : i32, i32, i32
  }
  func.func @transform_4(%arg0: i32) -> (i32, i32) {
    %c0_i32 = arith.constant 0 : i32
    %c0_i32_0 = arith.constant 0 : i32
    %c0_i32_1 = arith.constant 0 : i32
    return %c0_i32, %c0_i32_0 : i32, i32
  }
  func.func @transform_5(%arg0: i32) -> (i32, i32, i32) {
    %c0_i32 = arith.constant 0 : i32
    %c0_i32_0 = arith.constant 0 : i32
    %c0_i32_1 = arith.constant 0 : i32
    %c0_i32_2 = arith.constant 0 : i32
    return %c0_i32, %c0_i32_0, %c0_i32_1 : i32, i32, i32
  }
  func.func @transform_6(%arg0: i32) -> (i32, i32, i32) {
    %c0_i32 = arith.constant 0 : i32
    %c0_i32_0 = arith.constant 0 : i32
    %c0_i32_1 = arith.constant 0 : i32
    %c0_i32_2 = arith.constant 0 : i32
    return %c0_i32, %c0_i32_0, %c0_i32_1 : i32, i32, i32
  }
  func.func @transform_7(%arg0: i32) -> (i32, i32) {
    %c0_i32 = arith.constant 0 : i32
    %c0_i32_0 = arith.constant 0 : i32
    %c0_i32_1 = arith.constant 0 : i32
    return %c0_i32, %c0_i32_0 : i32, i32
  }
  func.func @transform_8(%arg0: i32) -> (i32, i32, i32) {
    %c0_i32 = arith.constant 0 : i32
    %c0_i32_0 = arith.constant 0 : i32
    %c0_i32_1 = arith.constant 0 : i32
    return %arg0, %c0_i32, %c0_i32_0 : i32, i32, i32
  }
}

module attributes {stable_mosaic.version = 11 : i64} {
  func.func @_matmul_bias_kernel(%arg0: i32, %arg1: i32, %arg2: i32, %arg3: memref<8x256xbf16, #tpu.memory_space<vmem>>, %arg4: memref<256x128xbf16, #tpu.memory_space<vmem>>, %arg5: memref<1x128xf32, #tpu.memory_space<vmem>>, %arg6: memref<8x128xf32, #tpu.memory_space<vmem>>, %arg7: memref<8x128xf32, #tpu.memory_space<vmem>>) attributes {dimension_semantics = [#tpu.dimension_semantics<parallel>, #tpu.dimension_semantics<parallel>, #tpu.dimension_semantics<arbitrary>], iteration_bounds = array<i64: 1, 1, 1>, scalar_prefetch = 0 : i64, scratch_operands = 1 : i64, tpu.core_type = #tpu.core_type<tc>, window_params = [{transform_indices = @transform_0, window_bounds = array<i64: 8, 256>}, {transform_indices = @transform_1, window_bounds = array<i64: 256, 128>}, {transform_indices = @transform_2, window_bounds = array<i64: 1, 128>}, {transform_indices = @transform_3, window_bounds = array<i64: 8, 128>}]} {
    %c0_i32 = arith.constant 0 : i32
    %0 = arith.cmpi eq, %arg2, %c0_i32 : i32
    %1 = arith.extui %0 : i1 to i32
    %c0_i32_0 = arith.constant 0 : i32
    %2 = arith.cmpi ne, %1, %c0_i32_0 : i32
    scf.if %2 {
      %cst_10 = arith.constant 0.000000e+00 : f32
      %12 = vector.broadcast %cst_10 : f32 to vector<8x128xf32>
      %c0_11 = arith.constant 0 : index
      %c0_12 = arith.constant 0 : index
      %13 = vector.load %arg7[%c0_11, %c0_12] : memref<8x128xf32, #tpu.memory_space<vmem>>, vector<8x128xf32>
      tpu.vector_store %arg7[%c0_11, %c0_12], %12 {strides = array<i32>} : memref<8x128xf32, #tpu.memory_space<vmem>>, vector<8x128xf32>,
    } else {
    }
    %c0 = arith.constant 0 : index
    %c0_1 = arith.constant 0 : index
    %3 = vector.load %arg7[%c0, %c0_1] : memref<8x128xf32, #tpu.memory_space<vmem>>, vector<8x128xf32>
    %c0_2 = arith.constant 0 : index
    %c0_3 = arith.constant 0 : index
    %4 = vector.load %arg3[%c0_2, %c0_3] : memref<8x256xbf16, #tpu.memory_space<vmem>>, vector<8x256xbf16>
    %c0_4 = arith.constant 0 : index
    %c0_5 = arith.constant 0 : index
    %5 = vector.load %arg4[%c0_4, %c0_5] : memref<256x128xbf16, #tpu.memory_space<vmem>>, vector<256x128xbf16>
    %cst = arith.constant dense<0.000000e+00> : vector<8x128xf32>
    %6 = tpu.matmul %4, %5, %cst {dimension_numbers = #tpu.dot_dimension_numbers<[1], [0], [0], [1], [0, 0, 1, 1], [], []>} : vector<8x256xbf16>, vector<256x128xbf16>, vector<8x128xf32> -> vector<8x128xf32>
    %7 = arith.addf %3, %6 : vector<8x128xf32>
    %c0_6 = arith.constant 0 : index
    %c0_7 = arith.constant 0 : index
    %8 = vector.load %arg7[%c0_6, %c0_7] : memref<8x128xf32, #tpu.memory_space<vmem>>, vector<8x128xf32>
    tpu.vector_store %arg7[%c0_6, %c0_7], %7 {strides = array<i32>} : memref<8x128xf32, #tpu.memory_space<vmem>>, vector<8x128xf32>,
    %c0_i32_8 = arith.constant 0 : i32
    %9 = arith.cmpi eq, %arg2, %c0_i32_8 : i32
    %10 = arith.extui %9 : i1 to i32
    %c0_i32_9 = arith.constant 0 : i32
    %11 = arith.cmpi ne, %10, %c0_i32_9 : i32
    scf.if %11 {
      %c0_10 = arith.constant 0 : index
      %c0_11 = arith.constant 0 : index
      %12 = vector.load %arg7[%c0_10, %c0_11] : memref<8x128xf32, #tpu.memory_space<vmem>>, vector<8x128xf32>
      %c0_12 = arith.constant 0 : index
      %c0_13 = arith.constant 0 : index
      %13 = vector.load %arg5[%c0_12, %c0_13] : memref<1x128xf32, #tpu.memory_space<vmem>>, vector<1x128xf32>
      %14 = vector.broadcast %13 : vector<1x128xf32> to vector<8x128xf32>
      %15 = arith.addf %12, %14 : vector<8x128xf32>
      %c0_14 = arith.constant 0 : index
      %c0_15 = arith.constant 0 : index
      %16 = vector.load %arg6[%c0_14, %c0_15] : memref<8x128xf32, #tpu.memory_space<vmem>>, vector<8x128xf32>
      tpu.vector_store %arg6[%c0_14, %c0_15], %15 {strides = array<i32>} : memref<8x128xf32, #tpu.memory_space<vmem>>, vector<8x128xf32>,
    } else {
    }
    return
  }
  func.func @transform_0(%arg0: i32, %arg1: i32, %arg2: i32) -> (i32, i32) {
    %c0_i32 = arith.constant 0 : i32
    return %arg0, %arg2 : i32, i32
  }
  func.func @transform_1(%arg0: i32, %arg1: i32, %arg2: i32) -> (i32, i32) {
    %c0_i32 = arith.constant 0 : i32
    return %arg2, %arg1 : i32, i32
  }
  func.func @transform_2(%arg0: i32, %arg1: i32, %arg2: i32) -> (i32, i32) {
    %c0_i32 = arith.constant 0 : i32
    %c0_i32_0 = arith.constant 0 : i32
    return %c0_i32, %arg1 : i32, i32
  }
  func.func @transform_3(%arg0: i32, %arg1: i32, %arg2: i32) -> (i32, i32) {
    %c0_i32 = arith.constant 0 : i32
    return %arg0, %arg1 : i32, i32
  }
}

</mosaic_0001>

<bundles_post_ra>
// kernel: _lambda_.5
= control target key start
LH: loop header
LB: loop body
LE: loop exit
PB: predicated region body
PF: predicated region fallthrough
CT: control target
= control target key end

     0   :  { %s352_s1 = inlined_call_operand.vmem [shape: bf16[256,128], index: 1, kind: input, shape index: {}]   ;;  %s353_s0 = inlined_call_operand.vmem [shape: bf16[8,256], index: 0, kind: input, shape index: {}]   ;;  %s354_s2 = inlined_call_operand.vmem [shape: f32[1,128], index: 2, kind: input, shape index: {}]   ;;  %s355_s3 = inlined_call_operand.vmem [shape: f32[8,128], index: 3, kind: output, shape index: {}]  }
   0x1   :  { %v257_v0 = vld [vmem:[%s352_s1 + $0x40] sm:$0xff]   ;;  %v259_v2 = vld [vmem:[%s352_s1 + $0x48] sm:$0xff]   ;;  %v261_v4 = vld [vmem:[%s352_s1 + $0x50] sm:$0xff]  }
   0x2   :  { %v258_v1 = vld [vmem:[%s352_s1] sm:$0xff]   ;;  %235 = vmatprep.subr.bf16.mxu0 %v257_v0  ;;  %v260_v3 = vld [vmem:[%s352_s1 + $0x8] sm:$0xff]   ;;  %v262_v5 = vld [vmem:[%s352_s1 + $0x10] sm:$0xff]  }
   0x3   :  { %236 = vmatpush3.bf16.msra.mxu0 %v258_v1  ;;  %v263_v6 = vld [vmem:[%s352_s1 + $0x58] sm:$0xff]   ;;  %v265_v8 = vld [vmem:[%s352_s1 + $0x60] sm:$0xff]   ;;  %v267_v10 = vld [vmem:[%s352_s1 + $0x68] sm:$0xff]  }
   0x4   :  { %237 = vmatprep.subr.bf16.mxu0 %v259_v2  ;;  %v264_v7 = vld [vmem:[%s352_s1 + $0x18] sm:$0xff]   ;;  %v266_v9 = vld [vmem:[%s352_s1 + $0x20] sm:$0xff]   ;;  %v268_v13 = vld [vmem:[%s352_s1 + $0x28] sm:$0xff]  }
   0x5   :  { %v21_v11 = vld [vmem:[%s353_s0] sm:$0xff]  ;;  %v269_v14 = vld [vmem:[%s352_s1 + $0x70] sm:$0xff]   ;;  %v271_v16 = vld [vmem:[%s352_s1 + $0x78] sm:$0xff]  }
   0x6   :  { %v217_v12 = vcombine.high %v21_v11, %v21_v11  ;;  %v270_v15 = vld [vmem:[%s352_s1 + $0x30] sm:$0xff]   ;;  %v272_v17 = vld [vmem:[%s352_s1 + $0x38] sm:$0xff]   ;;  %v216_v18 = vcombine.low %v21_v11, %v21_v11  ;;  %v234_v21 = vld [vmem:[%s354_s2] ss:$0 sm:$0xff] }
   0x7   :  { %238 = vmatpush3.bf16.msra.mxu0 %v260_v3 }
   0x8   :  { %239 = vmatprep.subr.bf16.mxu0 %v261_v4  ;;  %189 = vmatprep.mubr.bf16.mxu0 %v217_v12 }
   0xb   :  { %240 = vmatpush3.bf16.msra.mxu0 %v262_v5 }
   0xc   :  { %241 = vmatprep.subr.bf16.mxu0 %v263_v6 }
   0xf   :  { %242 = vmatpush3.bf16.msra.mxu0 %v264_v7 }
  0x10   :  { %243 = vmatprep.subr.bf16.mxu0 %v265_v8 }
  0x13   :  { %244 = vmatpush3.bf16.msra.mxu0 %v266_v9 }
  0x14   :  { %245 = vmatprep.subr.bf16.mxu0 %v267_v10 }
  0x17   :  { %246 = vmatpush3.bf16.msra.mxu0 %v268_v13 }
  0x18   :  { %247 = vmatprep.subr.bf16.mxu0 %v269_v14 }
  0x1b   :  { %248 = vmatpush3.bf16.msra.mxu0 %v270_v15 }
  0x1c   :  { %249 = vmatprep.subr.bf16.mxu0 %v271_v16 }
  0x1f   :  { %250 = vmatpush3.bf16.msra.mxu0 %v272_v17 }
  0x22   :  { %190 = vmatmul.mubr.bf16.vlgmr.msra.gmra.mrb[0].mxu0 %v216_v18 }
  0xf5   :  { %v251_v19 = vpop.f32.mrb[0].mxu0 }
  0xf6   :  { %v252_v20 = vpop.f32.mrb[1].mxu0 }
  0xf7   :  { %v253_v22 = vadd.f32 %v252_v20, %v251_v19  ;;  %v254_v23 = vpop.f32.mrb[2].mxu0 }
  0xf8   :  { %v255_v24 = vpop.f32.mrb[3].mxu0 }
  0xf9   :  { %v210_v25 = vadd.f32 %v253_v22, %v234_v21 }
  0xfb   :  { %211 = vst [vmem:[%s355_s3] sm:$0xff] %v210_v25 }

// kernel: _lambda_.4
= control target key start
LH: loop header
LB: loop body
LE: loop exit
PB: predicated region body
PF: predicated region fallthrough
CT: control target
= control target key end

     0   :  { %s892_s18 = smov 0   ;;  %s983_s0 = inlined_call_operand.vmem [shape: f32[2,10,4], index: 0, kind: input, shape index: {}]   ;;  %s984_s1 = inlined_call_operand.vmem [shape: bf16[3,4,8], index: 1, kind: input, shape index: {}]   ;;  %s985_s2 = inlined_call_operand.vmem [shape: bf16[3,4,8], index: 2, kind: input, shape index: {}]   ;;  %s986_s3 = inlined_call_operand.vmem [shape: bf16[3,8,16], index: 3, kind: input, shape index: {}]   ;;  %s987_s4 = inlined_call_operand.vmem [shape: f32[1,16], index: 4, kind: input, shape index: {}]   ;;  %s988_s5 = inlined_call_operand.vmem [shape: bf16[2,4,16], index: 5, kind: output, shape index: {}]  }
   0x1 LB: > { %s735_s19 = sadd.s32 4294967295, %s858_s18   ;;  %p739_p0 = scmp.ge.s32.totalorder %s858_s18, 1  ;;  %s858_s18 = sphi %s892_s18, %s15_s18  }
   0x2   : > { %p187_p1 = scmp.lt.s32.totalorder %s858_s18, 3 }
   0x4   : > { %p188_p2 = pnand %p739_p0, %p187_p1 }
   0x5   : > { %v743_v0 = vld [vmem:[%s984_s1 + $0x2] sm:$0x3] (!%p188_p2)  ;;  %vm242_vm0 = vcmask (!%p188_p2), 1041408   ;;  %p214_p3 = scmp.lt.s32.totalorder (!%p188_p2), %s735_s19, 1  ;;  %v860_v1 = vmov (!%p188_p2), 0.0   ;;  %vm861_vm1 = vmmov (!%p188_p2), 0  }
   0x6   : > { %191 = sbr.rel (%p188_p2) target bundleno = 932 (0x3a4), region = 40  ;;  %780 = vmatprep.subr.bf16.mxu0 (!%p188_p2), %v860_v1  ;;  %v244_v2 = vsel (!%p188_p2), %vm242_vm0, %v743_v0, 0  ;;  %782 = vmatprep.mubr.msk.bf16.mxu0 (!%p188_p2), %vm861_vm1, %v860_v1  ;;  %v227_v8 = vld [vmem:[%s984_s1] sm:$0x3] (!%p188_p2)  ;;  %vm238_vm2 = vcmask (!%p188_p2), 31744   ;;  %vm389_vm3 = vcmask (!%p188_p2), 1043456  }
   0x7   : > { %781 = vmatpush3.bf16.msra.mxu0 (!%p188_p2), %v244_v2  ;;  %798 = vmatprep.subr.bf16.mxu1 (!%p188_p2), %v860_v1  ;;  %v290_v11 = vsel (!%p188_p2), %vm242_vm0, %v227_v8, 0  ;;  %v746_v12 = vld [vmem:[%s984_s1 + $0x4] sm:$0x3] (!%p188_p2)  ;;  %v384_v22 = vld [vmem:[%s985_s2] sm:$0x3] (!%p188_p2)  ;;  %vm385_vm4 = vcmask (!%p188_p2), 64512  }
   0x8   : > { %786 = vmatprep.subr.bf16.mxu0 (!%p188_p2), %v860_v1  ;;  %800 = vmatprep.mubr.msk.bf16.mxu1 (!%p188_p2), %vm861_vm1, %v860_v1  ;;  %v340_v14 = vsel (!%p188_p2), %vm242_vm0, %v746_v12, 0  ;;  %v749_v23 = vld [vmem:[%s985_s2 + $0x2] sm:$0x3] (!%p188_p2)  ;;  %v751_v26 = vld [vmem:[%s986_s3 + $0x4] sm:$0xf] (!%p188_p2)  ;;  %vm680_vm5 = vcmask (!%p188_p2), 123904  }
   0x9   : > { %v434_v24 = vld [vmem:[%s986_s3] sm:$0xf] (!%p188_p2)  ;;  %v487_v27 = vsel (!%p188_p2), %vm389_vm3, %v751_v26, 0  ;;  %v754_v38 = vld [vmem:[%s985_s2 + $0x4] sm:$0x3] (!%p188_p2) }
   0xa   : > { %v533_v25 = vsel (!%p188_p2), %vm389_vm3, %v434_v24, 0  ;;  %v756_v39 = vld [vmem:[%s986_s3 + $0x8] sm:$0xf] (!%p188_p2)  ;;  %v758_v56 = vld [vmem:[%s987_s4] ss:$0 sm:$0xff] (!%p188_p2) }
   0xb   : > { %v627_v40 = vsel (!%p188_p2), %vm389_vm3, %v756_v39, 0 }
   0xd   : > { %s990_s19 = smov (!%p214_p3, %s735_s19), 1 }
   0xe   : > { %s761_s22 = sshll.u32 %s990_s19, 4  ;;  %s742_s21 = sshll.u32 %s990_s19, 1 }
   0xf   : > { %s218_s25 = scalar_lea.vmem %s983_s0, %s761_s22  ;;  %s222_s24 = scalar_lea.vmem %s988_s5, %s742_s21 }
  0x10   : > { %v224_v3 = vld [vmem:[%s218_s25] sm:$0xff]  ;;  %v225_v4 = vld [vmem:[%s218_s25 + $0x8] sm:$0x3] }
  0x11   : > { %v228_v5 = vpack.c.bf16 %v225_v4, %v224_v3  ;;  %v226_v13 = vpack.c.bf16 %v224_v3, %v224_v3 }
  0x13   : > { %v232_v6 = vshrl.u32 %v228_v5, 16  ;;  %v234_v7 = vshll.u32 %v228_v5, 16  ;;  %v335_v15 = vrot.slane %v228_v5, 1 }
  0x15   : > { %v236_v9 = vrot.slane %v234_v7, 1 }
  0x17   : > { %v237_v10 = vor.u32 %v236_v9, %v232_v6 }
  0x19   : > { %783 = vmatmul.mubr.msk.bf16.vlgmr.msra.gmra.mrb[0].mxu0 %vm238_vm2, %v237_v10 }
  0x1a   : > { %787 = vmatpush3.bf16.msra.mxu0 %v290_v11  ;;  %788 = vmatprep.mubr.msk.bf16.mxu0 %vm861_vm1, %v860_v1 }
  0x1b   : > { %792 = vmatprep.subr.bf16.mxu0 %v860_v1 }
  0x25   : > { %789 = vmatmul.mubr.msk.bf16.vlgmr.msra.gmra.mrb[0].mxu0 %vm238_vm2, %v226_v13 }
  0x26   : > { %793 = vmatpush3.bf16.msra.mxu0 %v340_v14  ;;  %794 = vmatprep.mubr.msk.bf16.mxu0 %vm861_vm1, %v860_v1 }
  0x27   : > { %816 = vmatprep.subr.bf16.mxu0 %v860_v1 }
  0x31   : > { %795 = vmatmul.mubr.msk.bf16.vlgmr.msra.gmra.mrb[0].mxu0 %vm238_vm2, %v335_v15 }
  0x32   : > { %818 = vmatprep.mubr.msk.bf16.mxu0 %vm861_vm1, %v860_v1  ;;  %817 = vmatpush3.bf16.msra.mxu0 %v533_v25 }
  0x33   : > { %828 = vmatprep.subr.bf16.mxu0 %v860_v1 }
 0x104   : > { %v376_v16 = vpop.f32.mrb[0].mxu0 }
 0x105   : > { %v383_v17 = vpack.c.bf16 %v376_v16, %v376_v16  ;;  %v796_v18 = vpop.f32.mrb[1].mxu0 }
 0x106   : > { %v379_v19 = vpop.f32.mrb[2].mxu0 }
 0x107   : > { %v797_v20 = vpop.f32.mrb[3].mxu0  ;;  %v391_v21 = vsel %vm389_vm3, %v383_v17, 0 }
 0x108   : > { %799 = vmatpush3.bf16.msra.mxu1 %v391_v21 }
 0x109   : > { %804 = vmatprep.subr.bf16.mxu1 %v860_v1 }
 0x10b   : > { %801 = vmatmul.mubr.msk.bf16.vlgmr.msra.gmra.mrb[0].mxu1 %vm385_vm4, %v384_v22 }
 0x10c   : > { %805 = vmatpush3.bf16.msra.mxu1 %v391_v21  ;;  %806 = vmatprep.mubr.msk.bf16.mxu1 %vm861_vm1, %v860_v1 }
 0x10d   : > { %810 = vmatprep.subr.bf16.mxu1 %v860_v1 }
 0x113   : > { %807 = vmatmul.mubr.msk.bf16.vlgmr.msra.gmra.mrb[4].mxu1 %vm385_vm4, %v749_v23 }
 0x114   : > { %812 = vmatprep.mubr.msk.bf16.mxu1 %vm861_vm1, %v860_v1  ;;  %811 = vmatpush3.bf16.msra.mxu1 %v487_v27 }
 0x115   : > { %822 = vmatprep.subr.bf16.mxu1 %v860_v1 }
 0x1de   : > { %v427_v28 = vpop.f32.mrb[0].mxu1 }
 0x1df   : > { %v433_v29 = vpack.c.bf16 %v427_v28, %v427_v28  ;;  %v802_v30 = vpop.f32.mrb[1].mxu1 }
 0x1e0   : > { %v430_v31 = vpop.f32.mrb[2].mxu1 }
 0x1e1   : > { %v803_v32 = vpop.f32.mrb[3].mxu1  ;;  %819 = vmatmul.mubr.msk.bf16.vlgmr.msra.gmra.mrb[4].mxu0 %vm385_vm4, %v433_v29 }
 0x1e2   : > { %830 = vmatprep.mubr.msk.bf16.mxu0 %vm861_vm1, %v860_v1  ;;  %829 = vmatpush3.bf16.msra.mxu0 %v627_v40 }
 0x1e6   : > { %v474_v33 = vpop.f32.mrb[4].mxu1 }
 0x1e7   : > { %v480_v34 = vpack.c.bf16 %v474_v33, %v474_v33  ;;  %v808_v35 = vpop.f32.mrb[5].mxu1 }
 0x1e8   : > { %v477_v36 = vpop.f32.mrb[6].mxu1 }
 0x1e9   : > { %v809_v37 = vpop.f32.mrb[7].mxu1  ;;  %813 = vmatmul.mubr.msk.bf16.vlgmr.msra.gmra.mrb[8].mxu1 %vm385_vm4, %v480_v34 }
 0x1ea   : > { %823 = vmatpush3.bf16.msra.mxu1 %v391_v21  ;;  %824 = vmatprep.mubr.msk.bf16.mxu1 %vm861_vm1, %v860_v1 }
 0x1f1   : > { %825 = vmatmul.mubr.msk.bf16.vlgmr.msra.gmra.mrb[12].mxu1 %vm385_vm4, %v754_v38 }
 0x2b4   : > { %v569_v41 = vpop.f32.mrb[4].mxu0 }
 0x2b5   : > { %v820_v42 = vpop.f32.mrb[5].mxu0 }
 0x2b6   : > { %v572_v43 = vpop.f32.mrb[6].mxu0 }
 0x2b7   : > { %v821_v44 = vpop.f32.mrb[7].mxu0 }
 0x2bc   : > { %v523_v45 = vpop.f32.mrb[8].mxu1 }
 0x2bd   : > { %v570_v46 = vadd.f32 %v569_v41, %v523_v45  ;;  %v814_v47 = vpop.f32.mrb[9].mxu1 }
 0x2be   : > { %v526_v48 = vpop.f32.mrb[10].mxu1 }
 0x2bf   : > { %v815_v49 = vpop.f32.mrb[11].mxu1 }
 0x2c4   : > { %v614_v50 = vpop.f32.mrb[12].mxu1 }
 0x2c5   : > { %v620_v51 = vpack.c.bf16 %v614_v50, %v614_v50  ;;  %v826_v52 = vpop.f32.mrb[13].mxu1 }
 0x2c6   : > { %v617_v53 = vpop.f32.mrb[14].mxu1 }
 0x2c7   : > { %v827_v54 = vpop.f32.mrb[15].mxu1  ;;  %831 = vmatmul.mubr.msk.bf16.vlgmr.msra.gmra.mrb[8].mxu0 %vm385_vm4, %v620_v51 }
 0x39a   : > { %v663_v55 = vpop.f32.mrb[8].mxu0 }
 0x39b   : > { %v669_v57 = vadd.f32 %v663_v55, %v570_v46  ;;  %v832_v58 = vpop.f32.mrb[9].mxu0 }
 0x39c   : > { %v666_v59 = vpop.f32.mrb[10].mxu0 }
 0x39d   : > { %v677_v60 = vadd.f32 %v758_v56, %v669_v57  ;;  %v833_v61 = vpop.f32.mrb[11].mxu0 }
 0x39f   : > { %v678_v62 = vmax.f32 %v677_v60, 0.0 }
 0x3a1   : > { %v679_v63 = vpack.c.bf16 %v678_v62, %v678_v62 }
 0x3a3   : > { %681 = vst.msk [vmem:[%s222_s24] sm:$0x3] %vm680_vm5, %v679_v63 }
 0x3a4 PF: > { %s15_s18 = sadd.s32 1, %s858_s18  }
 0x3a5   : > { %p12_p4 = scmp.ge.s32.totalorder %s15_s18, 4  }
 0x3a7   :  { %14 = sbr.rel (!%p12_p4) target bundleno = 1 (0x1), region = 76 }

// kernel: _lambda_.3
= control target key start
LH: loop header
LB: loop body
LE: loop exit
PB: predicated region body
PF: predicated region fallthrough
CT: control target
= control target key end

     0   :  { %s1372_s27 = smov 0   ;;  %s1511_s0 = inlined_call_operand.vmem [shape: f32[2,18,4], index: 0, kind: input, shape index: {}]   ;;  %s1512_s1 = inlined_call_operand.vmem [shape: bf16[3,4,8], index: 1, kind: input, shape index: {}]   ;;  %s1513_s2 = inlined_call_operand.vmem [shape: bf16[3,8,16], index: 2, kind: input, shape index: {}]   ;;  %s1514_s3 = inlined_call_operand.vmem [shape: bf16[3,8,16], index: 3, kind: input, shape index: {}]   ;;  %s1515_s4 = inlined_call_operand.vmem [shape: f32[1,16], index: 4, kind: input, shape index: {}]   ;;  %s1516_s5 = inlined_call_operand.vmem [shape: bf16[3,4,8], index: 5, kind: input, shape index: {}]   ;;  %s1517_s6 = inlined_call_operand.vmem [shape: bf16[3,16,32], index: 6, kind: input, shape index: {}]   ;;  %s1518_s7 = inlined_call_operand.vmem [shape: f32[1,32], index: 7, kind: input, shape index: {}]   ;;  %s1519_s8 = inlined_call_operand.vmem [shape: bf16[2,4,32], index: 8, kind: output, shape index: {}]  }
   0x1 LB: > { %s1134_s28 = sadd.s32 4294967295, %s1323_s27   ;;  %p1138_p0 = scmp.ge.s32.totalorder %s1323_s27, 1  ;;  %s1323_s27 = sphi %s1372_s27, %s18_s27  }
   0x2   : > { %p262_p1 = scmp.lt.s32.totalorder %s1323_s27, 3 }
   0x4   : > { %p263_p2 = pnand %p1138_p0, %p262_p1 }
   0x5   : > { %v1141_v0 = vld [vmem:[%s1512_s1 + $0x2] sm:$0x3] (!%p263_p2)  ;;  %vm330_vm0 = vcmask (!%p263_p2), 1041408   ;;  %p295_p3 = scmp.lt.s32.totalorder (!%p263_p2), %s1134_s28, 1  ;;  %v1325_v1 = vmov (!%p263_p2), 0.0   ;;  %vm1326_vm1 = vmmov (!%p263_p2), 0  }
   0x6   : > { %266 = sbr.rel (%p263_p2) target bundleno = 1595 (0x63b), region = 52  ;;  %1205 = vmatprep.subr.bf16.mxu0 (!%p263_p2), %v1325_v1  ;;  %v332_v2 = vsel (!%p263_p2), %vm330_vm0, %v1141_v0, 0  ;;  %1207 = vmatprep.mubr.msk.bf16.mxu0 (!%p263_p2), %vm1326_vm1, %v1325_v1  ;;  %v309_v13 = vld [vmem:[%s1512_s1] sm:$0x3] (!%p263_p2)  ;;  %vm313_vm2 = vsmask.f32 (!%p263_p2), 7424 }
   0x7   : > { %1206 = vmatpush3.bf16.msra.mxu0 (!%p263_p2), %v332_v2  ;;  %1223 = vmatprep.subr.bf16.mxu1 (!%p263_p2), %v1325_v1  ;;  %vm326_vm3 = vcmask (!%p263_p2), 31744   ;;  %v378_v15 = vsel (!%p263_p2), %vm330_vm0, %v309_v13, 0  ;;  %v1144_v17 = vld [vmem:[%s1512_s1 + $0x4] sm:$0x3] (!%p263_p2)  ;;  %vm425_vm4 = vcmask (!%p263_p2), 1046528   ;;  %vm480_vm5 = vcmask (!%p263_p2), 130048  }
   0x8   : > { %1211 = vmatprep.subr.bf16.mxu0 (!%p263_p2), %v1325_v1  ;;  %1225 = vmatprep.mubr.msk.bf16.mxu1 (!%p263_p2), %vm1326_vm1, %v1325_v1  ;;  %v433_v18 = vsel (!%p263_p2), %vm330_vm0, %v1144_v17, 0  ;;  %v479_v27 = vld [vmem:[%s1513_s2] sm:$0xf] (!%p263_p2)  ;;  %v1147_v28 = vld [vmem:[%s1513_s2 + $0x4] sm:$0xf] (!%p263_p2)  ;;  %vm578_vm6 = vcmask (!%p263_p2), 1043456  }
   0x9   : > { %v525_v29 = vld [vmem:[%s1514_s3] sm:$0xf] (!%p263_p2)  ;;  %v1149_v31 = vld [vmem:[%s1514_s3 + $0x4] sm:$0xf] (!%p263_p2)  ;;  %vm574_vm7 = vcmask (!%p263_p2), 64512   ;;  %vm1079_vm8 = vcmask (!%p263_p2), 254976  }
   0xa   : > { %v626_v30 = vsel (!%p263_p2), %vm578_vm6, %v525_v29, 0  ;;  %v580_v32 = vsel (!%p263_p2), %vm578_vm6, %v1149_v31, 0  ;;  %v1152_v43 = vld [vmem:[%s1513_s2 + $0x8] sm:$0xf] (!%p263_p2)  ;;  %v1156_v61 = vld [vmem:[%s1515_s4] ss:$0 sm:$0xff] (!%p263_p2) }
   0xb   : > { %v1154_v44 = vld [vmem:[%s1514_s3 + $0x8] sm:$0xf] (!%p263_p2) }
   0xc   : > { %v720_v45 = vsel (!%p263_p2), %vm578_vm6, %v1154_v44, 0 }
   0xd   : > { %s1521_s28 = smov (!%p295_p3, %s1134_s28), 1 }
   0xe   : > { %s1303_s9 = smul.u32 24, %s1521_s28  ;;  %s1140_s25 = sshll.u32 %s1521_s28, 1 }
   0xf   : > { %s303_s30 = scalar_lea.vmem %s1519_s8, %s1140_s25 }
  0x10   : > { %s299_s12 = scalar_lea.vmem %s1511_s0, %s1303_s9 }
  0x11   : > { %v305_v3 = vld [vmem:[%s299_s12] sm:$0xff]  ;;  %v306_v4 = vld [vmem:[%s299_s12 + $0x8] sm:$0xff]  ;;  %v307_v5 = vld [vmem:[%s299_s12 + $0x10] sm:$0x3] }
  0x12   : > { %v308_v6 = vpack.c.bf16 %v306_v4, %v305_v3  ;;  %v310_v7 = vpack.c.bf16 %v307_v5, %v307_v5 }
  0x14   : > { %v315_v8 = vshrl.u32 %v308_v6, 16  ;;  %v317_v9 = vshll.u32 %v308_v6, 16  ;;  %v322_v10 = vshll.u32 %v310_v7, 16  ;;  %v426_v19 = vrot.slane %v308_v6, 1 }
  0x15   : > { %v427_v20 = vrot.slane %v310_v7, 1  ;;  %v1158_v7 = vld [vmem:[%s1516_s5 + $0x2] sm:$0x3] }
  0x16   : > { %v319_v11 = vrot.slane %v317_v9, 1  ;;  %v324_v12 = vrot.slane %v322_v10, 1  ;;  %v1314_v9 = vld [vmem:[%s1517_s6 + $0x8] sm:$0xff]   ;;  %v1315_v10 = vld [vmem:[%s1517_s6] sm:$0xff]  }
  0x17   : > { %v428_v21 = vsel %vm425_vm4, %v426_v19, %v427_v20 }
  0x18   : > { %v320_v14 = vor.u32 %v319_v11, %v315_v8  ;;  %v773_v8 = vld [vmem:[%s1516_s5] sm:$0x3] }
  0x1a   : > { %v325_v16 = vsel %vm313_vm2, %v320_v14, %v324_v12 }
  0x1b   : > { %1208 = vmatmul.mubr.msk.bf16.vlgmr.msra.gmra.mrb[0].mxu0 %vm326_vm3, %v325_v16 }
  0x1c   : > { %1212 = vmatpush3.bf16.msra.mxu0 %v378_v15  ;;  %1213 = vmatprep.mubr.msk.bf16.mxu0 %vm1326_vm1, %v1325_v1 }
  0x1d   : > { %1217 = vmatprep.subr.bf16.mxu0 %v1325_v1 }
  0x27   : > { %1214 = vmatmul.mubr.msk.bf16.vlgmr.msra.gmra.mrb[0].mxu0 %vm326_vm3, %v308_v6 }
  0x28   : > { %1218 = vmatpush3.bf16.msra.mxu0 %v433_v18  ;;  %1219 = vmatprep.mubr.msk.bf16.mxu0 %vm1326_vm1, %v1325_v1 }
  0x29   : > { %1241 = vmatprep.subr.bf16.mxu0 %v1325_v1 }
  0x33   : > { %1220 = vmatmul.mubr.msk.bf16.vlgmr.msra.gmra.mrb[0].mxu0 %vm326_vm3, %v428_v21  ;;  %v1166_v21 = vld [vmem:[%s1516_s5 + $0x4] sm:$0x3] }
  0x34   : > { %1243 = vmatprep.mubr.msk.bf16.mxu0 %vm1326_vm1, %v1325_v1  ;;  %1242 = vmatpush3.bf16.msra.mxu0 %v626_v30 }
  0x35   : > { %1253 = vmatprep.subr.bf16.mxu0 %v1325_v1 }
 0x106   : > { %v469_v22 = vpop.f32.mrb[0].mxu0 }
 0x107   : > { %v1221_v23 = vpop.f32.mrb[1].mxu0 }
 0x108   : > { %v472_v24 = vpop.f32.mrb[2].mxu0 }
 0x109   : > { %v478_v25 = vpack.c.bf16 %v472_v24, %v469_v22  ;;  %v1222_v26 = vpop.f32.mrb[3].mxu0  ;;  %v1316_v22 = vld [vmem:[%s1517_s6 + $0x10] sm:$0xff]  }
 0x10b   : > { %1224 = vmatpush3.bf16.msra.mxu1 %v478_v25 }
 0x10c   : > { %1229 = vmatprep.subr.bf16.mxu1 %v1325_v1 }
 0x10e   : > { %1226 = vmatmul.mubr.msk.bf16.vlgmr.msra.gmra.mrb[0].mxu1 %vm480_vm5, %v479_v27 }
 0x10f   : > { %1230 = vmatpush3.bf16.msra.mxu1 %v478_v25  ;;  %1231 = vmatprep.mubr.msk.bf16.mxu1 %vm1326_vm1, %v1325_v1 }
 0x110   : > { %1235 = vmatprep.subr.bf16.mxu1 %v1325_v1 }
 0x116   : > { %1232 = vmatmul.mubr.msk.bf16.vlgmr.msra.gmra.mrb[4].mxu1 %vm480_vm5, %v1147_v28 }
 0x117   : > { %1237 = vmatprep.mubr.msk.bf16.mxu1 %vm1326_vm1, %v1325_v1  ;;  %1236 = vmatpush3.bf16.msra.mxu1 %v580_v32 }
 0x118   : > { %1247 = vmatprep.subr.bf16.mxu1 %v1325_v1 }
 0x1e1   : > { %v518_v33 = vpop.f32.mrb[0].mxu1 }
 0x1e2   : > { %v524_v34 = vpack.c.bf16 %v518_v33, %v518_v33  ;;  %v1227_v35 = vpop.f32.mrb[1].mxu1 }
 0x1e3   : > { %v521_v36 = vpop.f32.mrb[2].mxu1 }
 0x1e4   : > { %v1228_v37 = vpop.f32.mrb[3].mxu1  ;;  %1244 = vmatmul.mubr.msk.bf16.vlgmr.msra.gmra.mrb[4].mxu0 %vm574_vm7, %v524_v34 }
 0x1e5   : > { %1255 = vmatprep.mubr.msk.bf16.mxu0 %vm1326_vm1, %v1325_v1  ;;  %1254 = vmatpush3.bf16.msra.mxu0 %v720_v45  ;;  %v1172_v37 = vld [vmem:[%s1518_s7] ss:$0 sm:$0xff] }
 0x1e6   : > { %1265 = vmatprep.subr.bf16.mxu0 %v1325_v1 }
 0x1e9   : > { %v565_v38 = vpop.f32.mrb[4].mxu1 }
 0x1ea   : > { %v571_v39 = vpack.c.bf16 %v565_v38, %v565_v38  ;;  %v1233_v40 = vpop.f32.mrb[5].mxu1 }
 0x1eb   : > { %v568_v41 = vpop.f32.mrb[6].mxu1 }
 0x1ec   : > { %v1234_v42 = vpop.f32.mrb[7].mxu1  ;;  %1238 = vmatmul.mubr.msk.bf16.vlgmr.msra.gmra.mrb[8].mxu1 %vm574_vm7, %v571_v39 }
 0x1ed   : > { %1248 = vmatpush3.bf16.msra.mxu1 %v478_v25  ;;  %1249 = vmatprep.mubr.msk.bf16.mxu1 %vm1326_vm1, %v1325_v1 }
 0x1ee   : > { %1259 = vmatprep.subr.bf16.mxu1 %v1325_v1 }
 0x1f4   : > { %1250 = vmatmul.mubr.msk.bf16.vlgmr.msra.gmra.mrb[12].mxu1 %vm480_vm5, %v1152_v43 }
 0x1f5   : > { %1261 = vmatprep.mubr.msk.bf16.mxu1 %vm1326_vm1, %v1325_v1 }
 0x2b7   : > { %v662_v46 = vpop.f32.mrb[4].mxu0 }
 0x2b8   : > { %v1245_v47 = vpop.f32.mrb[5].mxu0 }
 0x2b9   : > { %v665_v48 = vpop.f32.mrb[6].mxu0 }
 0x2ba   : > { %v1246_v49 = vpop.f32.mrb[7].mxu0 }
 0x2bf   : > { %v616_v50 = vpop.f32.mrb[8].mxu1 }
 0x2c0   : > { %v663_v51 = vadd.f32 %v662_v46, %v616_v50  ;;  %v1239_v52 = vpop.f32.mrb[9].mxu1 }
 0x2c1   : > { %v619_v53 = vpop.f32.mrb[10].mxu1 }
 0x2c2   : > { %v1240_v54 = vpop.f32.mrb[11].mxu1 }
 0x2c7   : > { %v707_v55 = vpop.f32.mrb[12].mxu1 }
 0x2c8   : > { %v713_v56 = vpack.c.bf16 %v707_v55, %v707_v55  ;;  %v1251_v57 = vpop.f32.mrb[13].mxu1 }
 0x2c9   : > { %v710_v58 = vpop.f32.mrb[14].mxu1 }
 0x2ca   : > { %v1252_v59 = vpop.f32.mrb[15].mxu1  ;;  %1256 = vmatmul.mubr.msk.bf16.vlgmr.msra.gmra.mrb[8].mxu0 %vm574_vm7, %v713_v56 }
 0x2cb   : > { %1267 = vmatprep.mubr.msk.bf16.mxu0 %vm1326_vm1, %v1325_v1 }
 0x39d   : > { %v756_v60 = vpop.f32.mrb[8].mxu0 }
 0x39e   : > { %v762_v62 = vadd.f32 %v756_v60, %v663_v51  ;;  %v1257_v63 = vpop.f32.mrb[9].mxu0 }
 0x39f   : > { %v759_v0 = vpop.f32.mrb[10].mxu0 }
 0x3a0   : > { %v770_v2 = vadd.f32 %v1156_v61, %v762_v62  ;;  %v1258_v3 = vpop.f32.mrb[11].mxu0 }
 0x3a2   : > { %v771_v4 = vmax.f32 %v770_v2, 0.0 }
 0x3a4   : > { %v772_v5 = vpack.c.bf16 %v771_v4, %v771_v4 }
 0x3a6   : > { %v778_v6 = vsel %vm578_vm6, %v772_v5, 0 }
 0x3a7   : > { %1260 = vmatpush3.bf16.msra.mxu1 %v778_v6  ;;  %1266 = vmatpush3.bf16.msra.mxu0 %v778_v6 }
 0x3a8   : > { %1271 = vmatprep.subr.bf16.mxu1 %v1325_v1  ;;  %1277 = vmatprep.subr.bf16.mxu0 %v1325_v1 }
 0x3aa   : > { %1268 = vmatmul.mubr.msk.bf16.vlgmr.msra.gmra.mrb[12].mxu0 %vm574_vm7, %v1158_v7  ;;  %1262 = vmatmul.mubr.msk.bf16.vlgmr.msra.gmra.mrb[16].mxu1 %vm574_vm7, %v773_v8 }
 0x3ab   : > { %1272 = vmatpush3.bf16.msra.mxu1 %v1314_v9  ;;  %1273 = vmatprep.mubr.msk.bf16.mxu1 %vm1326_vm1, %v1325_v1 }
 0x3ac   : > { %1283 = vmatprep.subr.bf16.mxu1 %v1325_v1  ;;  %1279 = vmatprep.mubr.msk.bf16.mxu0 %vm1326_vm1, %v1325_v1 }
 0x3ad   : > { %1278 = vmatpush3.bf16.msra.mxu0 %v1315_v10 }
 0x3ae   : > { %1289 = vmatprep.subr.bf16.mxu0 %v1325_v1 }
 0x47d   : > { %v862_v11 = vpop.f32.mrb[12].mxu0  ;;  %v814_v12 = vpop.f32.mrb[16].mxu1 }
 0x47e   : > { %v868_v13 = vpack.c.bf16 %v862_v11, %v862_v11  ;;  %v1269_v14 = vpop.f32.mrb[13].mxu0  ;;  %v820_v15 = vpack.c.bf16 %v814_v12, %v814_v12  ;;  %v1263_v16 = vpop.f32.mrb[17].mxu1 }
 0x47f   : > { %v865_v17 = vpop.f32.mrb[14].mxu0  ;;  %v817_v18 = vpop.f32.mrb[18].mxu1 }
 0x480   : > { %1274 = vmatmul.mubr.msk.bf16.vlgmr.msra.gmra.mrb[20].mxu1 %vm480_vm5, %v868_v13  ;;  %v1270_v19 = vpop.f32.mrb[15].mxu0  ;;  %1280 = vmatmul.mubr.msk.bf16.vlgmr.msra.gmra.mrb[16].mxu0 %vm480_vm5, %v820_v15  ;;  %v1264_v20 = vpop.f32.mrb[19].mxu1 }
 0x481   : > { %1284 = vmatpush3.bf16.msra.mxu1 %v778_v6  ;;  %1285 = vmatprep.mubr.msk.bf16.mxu1 %vm1326_vm1, %v1325_v1 }
 0x482   : > { %1291 = vmatprep.mubr.msk.bf16.mxu0 %vm1326_vm1, %v1325_v1  ;;  %1290 = vmatpush3.bf16.msra.mxu0 %v1316_v22 }
 0x488   : > { %1286 = vmatmul.mubr.msk.bf16.vlgmr.msra.gmra.mrb[24].mxu1 %vm574_vm7, %v1166_v21 }
 0x553   : > { %v915_v23 = vpop.f32.mrb[20].mxu1  ;;  %v964_v24 = vpop.f32.mrb[16].mxu0 }
 0x554   : > { %v1275_v25 = vpop.f32.mrb[21].mxu1  ;;  %v965_v26 = vadd.f32 %v964_v24, %v915_v23  ;;  %v1281_v27 = vpop.f32.mrb[17].mxu0 }
 0x555   : > { %v918_v28 = vpop.f32.mrb[22].mxu1  ;;  %v967_v29 = vpop.f32.mrb[18].mxu0 }
 0x556   : > { %v1276_v1 = vpop.f32.mrb[23].mxu1  ;;  %v1282_v30 = vpop.f32.mrb[19].mxu0 }
 0x55b   : > { %v1009_v31 = vpop.f32.mrb[24].mxu1 }
 0x55c   : > { %v1015_v32 = vpack.c.bf16 %v1009_v31, %v1009_v31  ;;  %v1287_v33 = vpop.f32.mrb[25].mxu1 }
 0x55d   : > { %v1012_v34 = vpop.f32.mrb[26].mxu1 }
 0x55e   : > { %1292 = vmatmul.mubr.msk.bf16.vlgmr.msra.gmra.mrb[20].mxu0 %vm480_vm5, %v1015_v32  ;;  %v1288_v35 = vpop.f32.mrb[27].mxu1 }
 0x631   : > { %v1062_v36 = vpop.f32.mrb[20].mxu0 }
 0x632   : > { %v1068_v38 = vadd.f32 %v1062_v36, %v965_v26  ;;  %v1293_v39 = vpop.f32.mrb[21].mxu0 }
 0x633   : > { %v1065_v40 = vpop.f32.mrb[22].mxu0 }
 0x634   : > { %v1076_v41 = vadd.f32 %v1172_v37, %v1068_v38  ;;  %v1294_v42 = vpop.f32.mrb[23].mxu0 }
 0x636   : > { %v1077_v43 = vmax.f32 %v1076_v41, 0.0 }
 0x638   : > { %v1078_v44 = vpack.c.bf16 %v1077_v43, %v1077_v43 }
 0x63a   : > { %1080 = vst.msk [vmem:[%s303_s30] sm:$0x3] %vm1079_vm8, %v1078_v44 }
 0x63b PF: > { %s18_s27 = sadd.s32 1, %s1323_s27  }
 0x63c   : > { %p15_p4 = scmp.ge.s32.totalorder %s18_s27, 4  }
 0x63e   :  { %17 = sbr.rel (!%p15_p4) target bundleno = 1 (0x1), region = 92 }

</bundles_post_ra>
